<compile_context>
chip_gen: v5e
topology: v5e:2x2
jax: 0.10.0
libtpu: 0.0.40
codegen_flags: <defaults>
</compile_context>

<pallas_src>
import jax
import jax.numpy as jnp
from jax.experimental import pallas as pl
from jax.experimental.pallas import tpu as pltpu


def value_net_kernel(x_ref, w1_ref, b1_ref, w2_ref, b2_ref, w3_ref, b3_ref, o_ref):
    # x arrives as f32; cast to bf16 on the VPU inside the kernel (no standalone HBM pass).
    xb = x_ref[...].astype(jnp.bfloat16)
    # fc1 + ReLU (bf16 MXU matmul, f32 accumulate; K=161 left unpadded to save DMA bytes)
    h1 = jnp.dot(xb, w1_ref[...], preferred_element_type=jnp.float32)
    h1 = jnp.maximum(h1 + b1_ref[...], 0.0)
    # fc2 + ReLU
    h2 = jnp.dot(h1.astype(jnp.bfloat16), w2_ref[...], preferred_element_type=jnp.float32)
    h2 = jnp.maximum(h2 + b2_ref[...], 0.0)
    # out layer (N=1): VPU multiply + XLU lane-reduce; w3_ref is (1, hidden) f32.
    v = jnp.sum(h2 * w3_ref[...], axis=-1, keepdims=True) + b3_ref[...]
    o_ref[...] = v.astype(o_ref.dtype)


def _round_up(x, m):
    return ((x + m - 1) // m) * m


def value_network_forward(x, kernel_params, *, block_rows=2048, min_grid_steps=2):
    """x: (B, input_dim) f32.  Returns (B, 1) f32."""
    w1, b1, w2, b2, w3, b3 = kernel_params
    B, in_dim = x.shape

    # Batch tile: multiple of 8 sublanes, capped at block_rows, and capped at ~B/min_grid_steps
    # so a parallel grid of >=2 steps exists at moderate B (uses both TensorCores on v7x).
    tm = min(block_rows, max(8, _round_up(pl.cdiv(B, min_grid_steps), 8)))
    grid = (pl.cdiv(B, tm),)  # partial last block handled by Pallas clipping (rows independent)

    # Weights/biases stay resident in VMEM across grid steps (constant block index).
    const = lambda a: pl.BlockSpec(a.shape, lambda i: (0, 0))

    out = pl.pallas_call(
        value_net_kernel,
        out_shape=jax.ShapeDtypeStruct((B, 1), jnp.float32),
        grid=grid,
        in_specs=[
            pl.BlockSpec((tm, in_dim), lambda i: (i, 0)),  # x: tiled over batch
            const(w1), const(b1), const(w2), const(b2), const(w3), const(b3),
        ],
        out_specs=pl.BlockSpec((tm, 1), lambda i: (i, 0)),
        compiler_params=pltpu.CompilerParams(
            dimension_semantics=("parallel",),
            # 48 MiB: covers TM=4096 on v5e/v6e, stays under v7x's 64 MiB physical VMEM.
            vmem_limit_bytes=48 << 20,
        ),
    )(x, w1, b1, w2, b2, w3, b3)
    return out


def init_params(key, input_dim=161, hidden_dim=256):
    """Deterministic synthetic f32 parameters (shapes match the PyTorch module)."""
    k1, k2, k3, k4, k5, k6 = jax.random.split(key, 6)
    w1 = jax.random.normal(k1, (input_dim, hidden_dim), jnp.float32) * (1.0 / jnp.sqrt(input_dim))
    b1 = jax.random.normal(k2, (1, hidden_dim), jnp.float32) * 0.01
    w2 = jax.random.normal(k3, (hidden_dim, hidden_dim), jnp.float32) * (1.0 / jnp.sqrt(hidden_dim))
    b2 = jax.random.normal(k4, (1, hidden_dim), jnp.float32) * 0.01
    w3 = jax.random.normal(k5, (1, hidden_dim), jnp.float32) * (1.0 / jnp.sqrt(hidden_dim))  # row vec
    b3 = jax.random.normal(k6, (1, 1), jnp.float32) * 0.01
    return (w1, b1, w2, b2, w3, b3)


def to_kernel_params(params_f32):
    """Cast the big matmul weights to bf16 for the MXU; keep biases / final row in f32."""
    w1, b1, w2, b2, w3, b3 = params_f32
    return (w1.astype(jnp.bfloat16), b1, w2.astype(jnp.bfloat16), b2, w3, b3)


def reference_forward(x, params_f32):
    """Plain-JAX f32 reference of the PyTorch forward."""
    w1, b1, w2, b2, w3, b3 = params_f32
    h = jnp.maximum(x @ w1 + b1, 0.0)
    h = jnp.maximum(h @ w2 + b2, 0.0)
    return (h * w3).sum(axis=-1, keepdims=True) + b3  # == h @ w3.T + b3


if __name__ == "__main__":
    key = jax.random.PRNGKey(0)
    kx, kp = jax.random.split(key)

    B, INPUT_DIM, HIDDEN_DIM = 16, 161, 256
    x = jax.random.normal(kx, (B, INPUT_DIM), jnp.float32)
    params_f32 = init_params(kp, INPUT_DIM, HIDDEN_DIM)
    kernel_params = to_kernel_params(params_f32)

    out = value_network_forward(x, kernel_params)
    out = jax.block_until_ready(out)

    ref = reference_forward(x, params_f32)
    assert out.shape == (B, 1), out.shape
    # bf16 matmul inputs with f32 accumulation -> loosened tolerance vs. the f32 reference.
    assert jnp.allclose(out, ref, atol=5e-2, rtol=5e-2), "mismatch vs reference"

    print("KERNEL_OK")
</pallas_src>

<mosaic_0001>
module attributes {stable_mosaic.version = 11 : i64} {
  func.func @value_net_kernel(%arg0: i32, %arg1: memref<8x161xf32, #tpu.memory_space<vmem>>, %arg2: memref<161x256xbf16, #tpu.memory_space<vmem>>, %arg3: memref<1x256xf32, #tpu.memory_space<vmem>>, %arg4: memref<256x256xbf16, #tpu.memory_space<vmem>>, %arg5: memref<1x256xf32, #tpu.memory_space<vmem>>, %arg6: memref<1x256xf32, #tpu.memory_space<vmem>>, %arg7: memref<1x1xf32, #tpu.memory_space<vmem>>, %arg8: memref<8x1xf32, #tpu.memory_space<vmem>>) attributes {dimension_semantics = [#tpu.dimension_semantics<parallel>], iteration_bounds = array<i64: 2>, scalar_prefetch = 0 : i64, scratch_operands = 0 : i64, tpu.core_type = #tpu.core_type<tc>, window_params = [{transform_indices = @transform_0, window_bounds = array<i64: 8, 161>}, {pipeline_mode = #tpu.pipeline_mode<synchronous>, transform_indices = @transform_1, window_bounds = array<i64: 161, 256>}, {pipeline_mode = #tpu.pipeline_mode<synchronous>, transform_indices = @transform_2, window_bounds = array<i64: 1, 256>}, {pipeline_mode = #tpu.pipeline_mode<synchronous>, transform_indices = @transform_3, window_bounds = array<i64: 256, 256>}, {pipeline_mode = #tpu.pipeline_mode<synchronous>, transform_indices = @transform_4, window_bounds = array<i64: 1, 256>}, {pipeline_mode = #tpu.pipeline_mode<synchronous>, transform_indices = @transform_5, window_bounds = array<i64: 1, 256>}, {pipeline_mode = #tpu.pipeline_mode<synchronous>, transform_indices = @transform_6, window_bounds = array<i64: 1, 1>}, {transform_indices = @transform_7, window_bounds = array<i64: 8, 1>}]} {
    %c0 = arith.constant 0 : index
    %c0_0 = arith.constant 0 : index
    %0 = vector.load %arg1[%c0, %c0_0] : memref<8x161xf32, #tpu.memory_space<vmem>>, vector<8x161xf32>
    %1 = arith.truncf %0 : vector<8x161xf32> to vector<8x161xbf16>
    %c0_1 = arith.constant 0 : index
    %c0_2 = arith.constant 0 : index
    %2 = vector.load %arg2[%c0_1, %c0_2] : memref<161x256xbf16, #tpu.memory_space<vmem>>, vector<161x256xbf16>
    %cst = arith.constant dense<0.000000e+00> : vector<8x256xf32>
    %3 = tpu.matmul %1, %2, %cst {dimension_numbers = #tpu.dot_dimension_numbers<[1], [0], [0], [1], [0, 0, 1, 1], [], []>} : vector<8x161xbf16>, vector<161x256xbf16>, vector<8x256xf32> -> vector<8x256xf32>
    %c0_3 = arith.constant 0 : index
    %c0_4 = arith.constant 0 : index
    %4 = vector.load %arg3[%c0_3, %c0_4] : memref<1x256xf32, #tpu.memory_space<vmem>>, vector<1x256xf32>
    %5 = vector.broadcast %4 : vector<1x256xf32> to vector<8x256xf32>
    %6 = arith.addf %3, %5 : vector<8x256xf32>
    %cst_5 = arith.constant 0.000000e+00 : f32
    %7 = vector.broadcast %cst_5 : f32 to vector<8x256xf32>
    %8 = arith.maximumf %6, %7 : vector<8x256xf32>
    %9 = arith.truncf %8 : vector<8x256xf32> to vector<8x256xbf16>
    %c0_6 = arith.constant 0 : index
    %c0_7 = arith.constant 0 : index
    %10 = vector.load %arg4[%c0_6, %c0_7] : memref<256x256xbf16, #tpu.memory_space<vmem>>, vector<256x256xbf16>
    %cst_8 = arith.constant dense<0.000000e+00> : vector<8x256xf32>
    %11 = tpu.matmul %9, %10, %cst_8 {dimension_numbers = #tpu.dot_dimension_numbers<[1], [0], [0], [1], [0, 0, 1, 1], [], []>} : vector<8x256xbf16>, vector<256x256xbf16>, vector<8x256xf32> -> vector<8x256xf32>
    %c0_9 = arith.constant 0 : index
    %c0_10 = arith.constant 0 : index
    %12 = vector.load %arg5[%c0_9, %c0_10] : memref<1x256xf32, #tpu.memory_space<vmem>>, vector<1x256xf32>
    %13 = vector.broadcast %12 : vector<1x256xf32> to vector<8x256xf32>
    %14 = arith.addf %11, %13 : vector<8x256xf32>
    %cst_11 = arith.constant 0.000000e+00 : f32
    %15 = vector.broadcast %cst_11 : f32 to vector<8x256xf32>
    %16 = arith.maximumf %14, %15 : vector<8x256xf32>
    %c0_12 = arith.constant 0 : index
    %c0_13 = arith.constant 0 : index
    %17 = vector.load %arg6[%c0_12, %c0_13] : memref<1x256xf32, #tpu.memory_space<vmem>>, vector<1x256xf32>
    %18 = vector.broadcast %17 : vector<1x256xf32> to vector<8x256xf32>
    %19 = arith.mulf %16, %18 : vector<8x256xf32>
    %cst_14 = arith.constant dense<0.000000e+00> : vector<8xf32>
    %20 = vector.multi_reduction <add>, %19, %cst_14 [1] : vector<8x256xf32> to vector<8xf32>
    %21 = vector.shape_cast %20 : vector<8xf32> to vector<8x1xf32>
    %c0_15 = arith.constant 0 : index
    %c0_16 = arith.constant 0 : index
    %22 = vector.load %arg7[%c0_15, %c0_16] : memref<1x1xf32, #tpu.memory_space<vmem>>, vector<1x1xf32>
    %23 = vector.broadcast %22 : vector<1x1xf32> to vector<8x1xf32>
    %24 = arith.addf %21, %23 : vector<8x1xf32>
    %c0_17 = arith.constant 0 : index
    %c0_18 = arith.constant 0 : index
    %25 = vector.load %arg8[%c0_17, %c0_18] : memref<8x1xf32, #tpu.memory_space<vmem>>, vector<8x1xf32>
    tpu.vector_store %arg8[%c0_17, %c0_18], %24 {strides = array<i32>} : memref<8x1xf32, #tpu.memory_space<vmem>>, vector<8x1xf32>,
    return
  }
  func.func @transform_0(%arg0: i32) -> (i32, i32) {
    %c0_i32 = arith.constant 0 : i32
    %c0_i32_0 = arith.constant 0 : i32
    return %arg0, %c0_i32 : i32, i32
  }
  func.func @transform_1(%arg0: i32) -> (i32, i32) {
    %c0_i32 = arith.constant 0 : i32
    %c0_i32_0 = arith.constant 0 : i32
    %c0_i32_1 = arith.constant 0 : i32
    return %c0_i32, %c0_i32_0 : i32, i32
  }
  func.func @transform_2(%arg0: i32) -> (i32, i32) {
    %c0_i32 = arith.constant 0 : i32
    %c0_i32_0 = arith.constant 0 : i32
    %c0_i32_1 = arith.constant 0 : i32
    return %c0_i32, %c0_i32_0 : i32, i32
  }
  func.func @transform_3(%arg0: i32) -> (i32, i32) {
    %c0_i32 = arith.constant 0 : i32
    %c0_i32_0 = arith.constant 0 : i32
    %c0_i32_1 = arith.constant 0 : i32
    return %c0_i32, %c0_i32_0 : i32, i32
  }
  func.func @transform_4(%arg0: i32) -> (i32, i32) {
    %c0_i32 = arith.constant 0 : i32
    %c0_i32_0 = arith.constant 0 : i32
    %c0_i32_1 = arith.constant 0 : i32
    return %c0_i32, %c0_i32_0 : i32, i32
  }
  func.func @transform_5(%arg0: i32) -> (i32, i32) {
    %c0_i32 = arith.constant 0 : i32
    %c0_i32_0 = arith.constant 0 : i32
    %c0_i32_1 = arith.constant 0 : i32
    return %c0_i32, %c0_i32_0 : i32, i32
  }
  func.func @transform_6(%arg0: i32) -> (i32, i32) {
    %c0_i32 = arith.constant 0 : i32
    %c0_i32_0 = arith.constant 0 : i32
    %c0_i32_1 = arith.constant 0 : i32
    return %c0_i32, %c0_i32_0 : i32, i32
  }
  func.func @transform_7(%arg0: i32) -> (i32, i32) {
    %c0_i32 = arith.constant 0 : i32
    %c0_i32_0 = arith.constant 0 : i32
    return %arg0, %c0_i32 : i32, i32
  }
}

</mosaic_0001>

<bundles_post_ra>
// kernel: tpu_custom_call.1
= control target key start
LH: loop header
LB: loop body
LE: loop exit
PB: predicated region body
PF: predicated region fallthrough
CT: control target
= control target key end

     0   :  { %s1539_s0 = inlined_call_operand.hbm [shape: f32[16,161], index: 0, kind: input, shape index: {}]   ;;  %s1540_s1 = inlined_call_operand.hbm [shape: bf16[161,256], index: 1, kind: input, shape index: {}]   ;;  %s1541_s2 = inlined_call_operand.vmem [shape: f32[1,256], index: 2, kind: input, shape index: {}]   ;;  %s1542_s3 = inlined_call_operand.hbm [shape: bf16[256,256], index: 3, kind: input, shape index: {}]   ;;  %s1543_s4 = inlined_call_operand.vmem [shape: f32[1,256], index: 4, kind: input, shape index: {}]   ;;  %s1544_s5 = inlined_call_operand.vmem [shape: f32[1,256], index: 5, kind: input, shape index: {}]   ;;  %s1545_s6 = inlined_call_operand.<no memory space> [shape: f32[1,1], index: 6, kind: input, shape index: {}]   ;;  %s1546_s7 = inlined_call_operand.vmem [shape: f32[16,1], index: 7, kind: output, shape index: {}]  }
   0x1   :  { %v12_v0 = vstv %s1545_s6 }
   0x2   :  { %13 = vst [vmem:[#allocation2] sm:$0x1] %v12_v0 }
   0x3   :  { %14 = vsyncpa [#allocation4], 0 }
   0x4   :  { %16 = vsyncpa [#allocation4 + $0x1], 0 }
   0x5   :  { %17 = vsyncpa [#allocation6], 0  ;;  %s1412_s26 = smov 0   ;;  %s1414_s27 = smov 0  }
   0x6   :  { %s1416_s28 = smov 0   ;;  %s1418_s29 = smov 0  }
   0x7 LB: > { %s217_s8 = sshll.u32 %s1540_s1, 4  ;;  %s1436_s9 = sadd.s32 4294967295, %s1362_s29   ;;  %s1362_s29 = sphi %s1418_s29, %s1553_s29   ;;  %s1358_s28 = sphi %s1416_s28, %s1552_s28   ;;  %s1354_s27 = sphi %s1414_s27, %s1551_s27   ;;  %s1350_s26 = sphi %s1412_s26, %s1550_s26   ;;  %s218_s8 = int_to_ptr.hbm [resolvable:$true] %s217_s8 }
   0x8   : > { %p893_p0 = scmp.ge.s32.totalorder %s1362_s29, 1  ;;  %p44_p1 = scmp.eq.s32.totalorder %s1436_s9, 0 }
   0x9   : > { %p206_p2 = scmp.lt.s32.totalorder %s1362_s29, 3  ;;  %s1364_s11 = smov [#allocation5]  }
   0xa   : > { %s219_s12 = sshll.u32 %s1364_s11, 4  ;;  %s234_s15 = sshll.u32 %s1542_s3, 4  ;;  %s220_s12 = int_to_ptr.vmem [resolvable:$true] %s219_s12  ;;  %s235_s15 = int_to_ptr.hbm [resolvable:$true] %s234_s15 }
   0xb   : > { %p1441_p3 = pnand %p893_p0, %p206_p2  ;;  %s1365_s16 = smov [#allocation7]  }
   0xc   : > { %s236_s17 = sshll.u32 %s1365_s16, 4  ;;  %s1366_s18 = smov 128   ;;  %s237_s17 = int_to_ptr.vmem [resolvable:$true] %s236_s17 }
   0xd   : > { %p1180_p4 = pneg %p1441_p3  ;;  %s1367_s19 = smov 8  }
   0xe   : > { %s1453_s20 = sadd.s32 1, %s1362_s29   ;;  %s30_s22 = sadd.s32 1, %s1358_s28 }
   0xf   : > { %p1181_p5 = pnand %p1180_p4, %p44_p1  ;;  %s27_s21 = ssub.s32 %s1362_s29, %s1453_s20 }
  0x10   : > { %p28_p6 = scmp.eq.s32.totalorder %s27_s21, 0  ;;  %p37_p7 = scmp.ne.s32.totalorder %s1358_s28, %s1354_s27 }
  0x11   : > { %1183 = dma.hbm_to_vmem [thread:$0]  (!%p1181_p5), %s218_s8, 2688, %s220_s12, [#allocation6], %s1366_s18, %s1366_s18, %s1367_s19  }
  0x12   : > { %1186 = dma.hbm_to_vmem [thread:$0]  (!%p1181_p5), %s235_s15, 4096, %s237_s17, [#allocation6], %s1366_s18, %s1366_s18, %s1367_s19  }
  0x13   : > { %p38_p8 = scmp.eq.s32.totalorder %s1362_s29, 0  ;;  %p43_p9 = scmp.ne.s32.totalorder %s1354_s27, %s1350_s26 }
  0x14   : > { %s1464_s23 = scalar_select %p28_p6, %s1358_s28, %s30_s22  }
  0x15   : > { %p1468_p10 = por %p44_p1, %p43_p9  ;;  %p1193_p11 = scmp.lt.s32.totalorder %s1362_s29, 2 }
  0x16   : > { %s259_s25 = sand.u32 1, %s1358_s28   ;;  %s1117_s6 = sshll.u32 %s1362_s29, 4 }
  0x17   : > { %p39_p12 = por %p38_p8, %p37_p7  ;;  %s897_s30 = sshll.u32 %s259_s25, 4 }
  0x18   : > { %s268_s12 = scalar_lea.hbm %s1539_s0, %s1117_s6  ;;  %s263_s14 = scalar_lea.vmem [#allocation3], %s897_s30 }
  0x19   : > { %s270_s13 = sshll.u32 %s268_s12, 4  ;;  %s272_s15 = sshll.u32 %s263_s14, 4  ;;  %s271_s13 = int_to_ptr.hbm [resolvable:$true] %s270_s13  ;;  %s273_s15 = int_to_ptr.vmem [resolvable:$true] %s272_s15 }
  0x1a   : > { %p1478_p13 = pnand %p1193_p11, %p39_p12  ;;  %s260_s16 = scalar_lea.sflag [#allocation4], %s259_s25 }
  0x1b   : > { %s1294_s17 = sshra.s32 %s271_s13, 4  ;;  %s1301_s21 = scalar_lea.hbm %s1539_s0, 32  ;;  %s1295_s17 = int_to_ptr.hbm [resolvable:$true] %s1294_s17 }
  0x1c   : > { %s1296_s29 = scalar_lea.hbm %s1295_s17, 16  ;;  %p1298_p2 = pneg %p1478_p13 }
  0x1d   : > { %p1297_p0 = scmp.ne.s32.totalorder %s1295_s17, %s1296_s29  ;;  %p1302_p6 = scmp.lt.s32.totalorder %s1295_s17, %s1539_s0 }
  0x1e   : > { %p1303_p7 = scmp.lt.s32.totalorder %s1301_s21, %s1296_s29 }
  0x1f   : > { %p1299_p4 = pnand %p1298_p2, %p1297_p0 }
  0x20   : > { %p1304_p8 = por %p1303_p7, %p1302_p6 }
  0x21   : > { %p1300_p5 = pneg %p1299_p4 }
  0x23   : > { %p1305_p9 = pnand %p1304_p8, %p1300_p5 }
  0x25   : > { %1308 = shalt.err (!%p1305_p9)
}
  0x26   : > { %1190 = dma.hbm_to_vmem [thread:$0]  (!%p1478_p13), %s271_s13, 256, %s273_s15, %s260_s16  }
  0x27   : > { %281 = sbr.rel (%p1441_p3) target bundleno = 480 (0x1e0), region = 48  ;;  %s283_s25 = sand.u32 (!%p1441_p3), 1, %s1354_s27  }
  0x28   : > { %s1495_s30 = sshll.u32 (!%p1441_p3), %s283_s25, 4  ;;  %s284_s8 = scalar_lea.sflag (!%p1441_p3), [#allocation4], %s283_s25 }
  0x29   : > { %s287_s11 = scalar_lea.vmem (!%p1441_p3), [#allocation3], %s1495_s30 }
  0x2c   : > { %1341 = dma.done.wait (%p1468_p10), %s284_s8, 256  }
  0x2d   : > { %1343 = vsyncadd (%p1468_p10), %s284_s8, 4294967040 }
  0x2e   : > { %1345 = dma.done.wait (%p44_p1), [#allocation6], 6784  }
  0x2f   : > { %1347 = vsyncadd (%p44_p1), [#allocation6], 4294960512  ;;  %v1132_v1 = vld [vmem:[#allocation5 + $0x74] sm:$0xf]  ;;  %v965_v2 = vld [vmem:[#allocation5 + $0x78] sm:$0xf0] }
  0x30   : > { %v963_v3 = vld [vmem:[#allocation5 + $0x70] sm:$0xf]  ;;  %v968_v4 = vor.u32 %v1132_v1, %v965_v2  ;;  %v1133_v5 = vld [vmem:[#allocation5 + $0x74] sm:$0xf0]  ;;  %v1130_v6 = vld [vmem:[#allocation5 + $0x64] sm:$0xf] }
  0x31   : > { %v957_v7 = vld [vmem:[#allocation5 + $0x68] sm:$0xf0]  ;;  %v964_v8 = vor.u32 %v1133_v5, %v963_v3  ;;  %v955_v9 = vld [vmem:[#allocation5 + $0x60] sm:$0xf]  ;;  %v1131_v10 = vld [vmem:[#allocation5 + $0x64] sm:$0xf0] }
  0x32   : > { %508 = vmatpush.bf16.msra.mxu2 %v968_v4  ;;  %v960_v11 = vor.u32 %v1130_v6, %v957_v7  ;;  %v956_v12 = vor.u32 %v1131_v10, %v955_v9  ;;  %v1128_v13 = vld [vmem:[#allocation5 + $0x54] sm:$0xf]  ;;  %v949_v14 = vld [vmem:[#allocation5 + $0x58] sm:$0xf0]  ;;  %vm473_vm0 = vcmask 1040384   ;;  %v1368_v21 = vmov 0  }
  0x33   : > { %482 = vmatpush.bf16.msra.mxu0 %v964_v8  ;;  %v947_v15 = vld [vmem:[#allocation5 + $0x50] sm:$0xf]  ;;  %v1129_v16 = vld [vmem:[#allocation5 + $0x54] sm:$0xf0]  ;;  %v357_v17 = vld [vmem:[#allocation5 + $0xa0] sm:$0x11]  ;;  %v952_v20 = vor.u32 %v1128_v13, %v949_v14 }
  0x34   : > { %v426_v18 = vunpack.c.h.b16 %v357_v17  ;;  %v425_v19 = vunpack.c.l.b16 %v357_v17  ;;  %v475_v22 = vsel %vm473_vm0, 65535, %v1368_v21  ;;  %v948_v23 = vor.u32 %v1129_v16, %v947_v15  ;;  %v1126_v24 = vld [vmem:[#allocation5 + $0x44] sm:$0xf]  ;;  %v941_v25 = vld [vmem:[#allocation5 + $0x48] sm:$0xf0]  ;;  %p328_p1 = scmp.lt.s32.totalorder %s1436_s9, 1 }
  0x35   : > { %v939_v26 = vld [vmem:[#allocation5 + $0x40] sm:$0xf]  ;;  %v1127_v29 = vld [vmem:[#allocation5 + $0x44] sm:$0xf0]  ;;  %v1136_v30 = vld [vmem:[#allocation5 + $0x94] sm:$0xf]  ;;  %v944_v34 = vor.u32 %v1126_v24, %v941_v25 }
  0x36   : > { %509 = vmatpush.bf16.msra.mxu2 %v960_v11  ;;  %v448_v27 = vpack.c.b16 %v426_v18, %v426_v18  ;;  %v447_v28 = vpack.c.b16 %v425_v19, %v425_v19  ;;  %v981_v31 = vld [vmem:[#allocation5 + $0x98] sm:$0xf0]  ;;  %v979_v35 = vld [vmem:[#allocation5 + $0x90] sm:$0xf]  ;;  %v1137_v36 = vld [vmem:[#allocation5 + $0x94] sm:$0xf0]  ;;  %v940_v37 = vor.u32 %v1127_v29, %v939_v26 }
  0x37   : > { %483 = vmatpush.bf16.msra.mxu0 %v956_v12  ;;  %v1124_v38 = vld [vmem:[#allocation5 + $0x34] sm:$0xf]  ;;  %v933_v39 = vld [vmem:[#allocation5 + $0x38] sm:$0xf0]  ;;  %v931_v40 = vld [vmem:[#allocation5 + $0x30] sm:$0xf]  ;;  %v984_v41 = vor.u32 %v1136_v30, %v981_v31  ;;  %v980_v45 = vor.u32 %v1137_v36, %v979_v35 }
  0x38   : > { %v480_v32 = vand.u32 %v475_v22, %v448_v27  ;;  %v477_v33 = vand.u32 %v475_v22, %v447_v28  ;;  %v1125_v42 = vld [vmem:[#allocation5 + $0x34] sm:$0xf0]  ;;  %v1134_v43 = vld [vmem:[#allocation5 + $0x84] sm:$0xf]  ;;  %v973_v44 = vld [vmem:[#allocation5 + $0x88] sm:$0xf0]  ;;  %v936_v49 = vor.u32 %v1124_v38, %v933_v39 }
  0x39   : > { %v1122_v46 = vld [vmem:[#allocation5 + $0x24] sm:$0xf]  ;;  %v971_v47 = vld [vmem:[#allocation5 + $0x80] sm:$0xf]  ;;  %v1135_v48 = vld [vmem:[#allocation5 + $0x84] sm:$0xf0]  ;;  %v932_v53 = vor.u32 %v1125_v42, %v931_v40  ;;  %v976_v54 = vor.u32 %v1134_v43, %v973_v44 }
  0x3a   : > { %510 = vmatpush.bf16.msra.mxu2 %v952_v20  ;;  %526 = vmatpush.bf16.msra.mxu3 %v480_v32  ;;  %v925_v50 = vld [vmem:[#allocation5 + $0x28] sm:$0xf0]  ;;  %v1045_v51 = vld [vmem:[#allocation7 + $0x70] sm:$0xf]  ;;  %v1153_v52 = vld [vmem:[#allocation7 + $0x74] sm:$0xf0]  ;;  %v972_v60 = vor.u32 %v1135_v48, %v971_v47 }
  0x3b   : > { %484 = vmatpush.bf16.msra.mxu0 %v948_v23  ;;  %500 = vmatpush.bf16.msra.mxu1 %v477_v33  ;;  %v334_v55 = vld [vmem:[%s287_s11 + $0x8] sm:$0xff]  ;;  %v1169_v57 = vld [vmem:[#allocation7 + $0xf4] sm:$0xf0]  ;;  %v1046_v62 = vor.u32 %v1153_v52, %v1045_v51  ;;  %v928_v0 = vor.u32 %v1122_v46, %v925_v50  ;;  %v1151_v2 = vld [vmem:[#allocation7 + $0x64] sm:$0xf0]  ;;  %vm469_vm1 = vcmask 269312  }
  0x3c   : > { %v1109_v56 = vld [vmem:[#allocation7 + $0xf0] sm:$0xf]  ;;  %v923_v58 = vld [vmem:[#allocation5 + $0x20] sm:$0xf]  ;;  %v1123_v59 = vld [vmem:[#allocation5 + $0x24] sm:$0xf0]  ;;  %v336_v1 = vpack.c.bf16 %v334_v55, %v334_v55 }
  0x3d   : > { %v1110_v61 = vor.u32 %v1169_v57, %v1109_v56  ;;  %v1037_v63 = vld [vmem:[#allocation7 + $0x60] sm:$0xf]  ;;  %v1167_v4 = vld [vmem:[#allocation7 + $0xe4] sm:$0xf0]  ;;  %v924_v5 = vor.u32 %v1123_v59, %v923_v58  ;;  %v1120_v6 = vld [vmem:[#allocation5 + $0x14] sm:$0xf] }
  0x3e   : > { %511 = vmatpush.bf16.msra.mxu2 %v944_v34  ;;  %527 = vmatpush.bf16.msra.mxu3 %v984_v41  ;;  %v1101_v3 = vld [vmem:[#allocation7 + $0xe0] sm:$0xf]  ;;  %v917_v7 = vld [vmem:[#allocation5 + $0x18] sm:$0xf0]  ;;  %v915_v8 = vld [vmem:[#allocation5 + $0x10] sm:$0xf]  ;;  %v1038_v12 = vor.u32 %v1151_v2, %v1037_v63 }
  0x3f   : > { %485 = vmatpush.bf16.msra.mxu0 %v940_v37  ;;  %501 = vmatpush.bf16.msra.mxu1 %v980_v45  ;;  %v1121_v9 = vld [vmem:[#allocation5 + $0x14] sm:$0xf0]  ;;  %v1102_v10 = vor.u32 %v1167_v4, %v1101_v3  ;;  %v1118_v11 = vld [vmem:[#allocation5 + $0x4] sm:$0xf]  ;;  %v1165_v14 = vld [vmem:[#allocation7 + $0xd4] sm:$0xf0]  ;;  %v920_v15 = vor.u32 %v1120_v6, %v917_v7 }
  0x40   : > { %v1093_v13 = vld [vmem:[#allocation7 + $0xd0] sm:$0xf]  ;;  %v909_v16 = vld [vmem:[#allocation5 + $0x8] sm:$0xf0]  ;;  %v1149_v18 = vld [vmem:[#allocation7 + $0x54] sm:$0xf0]  ;;  %v916_v19 = vor.u32 %v1121_v9, %v915_v8 }
  0x41   : > { %v1029_v17 = vld [vmem:[#allocation7 + $0x50] sm:$0xf]  ;;  %v907_v20 = vld [vmem:[#allocation5] sm:$0xf]  ;;  %v1119_v21 = vld [vmem:[#allocation5 + $0x4] sm:$0xf0]  ;;  %v1094_v26 = vor.u32 %v1165_v14, %v1093_v13  ;;  %v912_v30 = vor.u32 %v1118_v11, %v909_v16 }
  0x42   : > { %512 = vmatpush.bf16.msra.mxu2 %v936_v49  ;;  %528 = vmatpush.bf16.msra.mxu3 %v976_v54  ;;  %v1152_v22 = vld [vmem:[#allocation7 + $0x74] sm:$0xf]  ;;  %v1047_v23 = vld [vmem:[#allocation7 + $0x78] sm:$0xf0]  ;;  %v1030_v27 = vor.u32 %v1149_v18, %v1029_v17  ;;  %v1085_v28 = vld [vmem:[#allocation7 + $0xc0] sm:$0xf]  ;;  %v908_v34 = vor.u32 %v1119_v21, %v907_v20 }
  0x43   : > { %486 = vmatpush.bf16.msra.mxu0 %v932_v53  ;;  %502 = vmatpush.bf16.msra.mxu1 %v972_v60  ;;  %v1168_v24 = vld [vmem:[#allocation7 + $0xf4] sm:$0xf]  ;;  %v1111_v25 = vld [vmem:[#allocation7 + $0xf8] sm:$0xf0]  ;;  %v1163_v29 = vld [vmem:[#allocation7 + $0xc4] sm:$0xf0]  ;;  %v1050_v36 = vor.u32 %v1152_v22, %v1047_v23 }
  0x44   : > { %v333_v31 = vld [vmem:[%s287_s11] sm:$0xff]  ;;  %v1021_v32 = vld [vmem:[#allocation7 + $0x40] sm:$0xf]  ;;  %v1114_v35 = vor.u32 %v1168_v24, %v1111_v25  ;;  %v1166_v37 = vld [vmem:[#allocation7 + $0xe4] sm:$0xf]  ;;  %v1086_v39 = vor.u32 %v1163_v29, %v1085_v28  ;;  %s1555_s9 = smov (!%p328_p1, %s1436_s9), 1 }
  0x45   : > { %986 = vmatmul.msk.bf16.vlgmr.msra.gmra.mxu3 %vm469_vm1, %v336_v1  ;;  %v1147_v33 = vld [vmem:[#allocation7 + $0x44] sm:$0xf0]  ;;  %v1103_v38 = vld [vmem:[#allocation7 + $0xe8] sm:$0xf0]  ;;  %v335_v40 = vpack.c.bf16 %v333_v31, %v333_v31  ;;  %v1150_v41 = vld [vmem:[#allocation7 + $0x64] sm:$0xf] }
  0x46   : > { %749 = vmatpush.bf16.msrb.mxu3 %v1110_v61  ;;  %513 = vmatpush.bf16.msra.mxu2 %v928_v0  ;;  %v1039_v42 = vld [vmem:[#allocation7 + $0x68] sm:$0xf0]  ;;  %v1022_v43 = vor.u32 %v1147_v33, %v1021_v32  ;;  %v1013_v44 = vld [vmem:[#allocation7 + $0x30] sm:$0xf]  ;;  %v1145_v45 = vld [vmem:[#allocation7 + $0x34] sm:$0xf0]  ;;  %v1106_v46 = vor.u32 %v1166_v37, %v1103_v38 }
  0x47   : > { %736 = vmatpush.bf16.msrb.mxu1 %v1046_v62  ;;  %487 = vmatpush.bf16.msra.mxu0 %v924_v5  ;;  %v1042_v47 = vor.u32 %v1150_v41, %v1039_v42  ;;  %v1164_v48 = vld [vmem:[#allocation7 + $0xd4] sm:$0xf]  ;;  %v1095_v49 = vld [vmem:[#allocation7 + $0xd8] sm:$0xf0]  ;;  %v1014_v52 = vor.u32 %v1145_v45, %v1013_v44  ;;  %v1162_v55 = vld [vmem:[#allocation7 + $0xc4] sm:$0xf] }
  0x48   : > { %985 = vmatmul.msk.bf16.vlgmr.msra.gmra.mxu1 %vm469_vm1, %v336_v1  ;;  %v1148_v50 = vld [vmem:[#allocation7 + $0x54] sm:$0xf]  ;;  %v1031_v51 = vld [vmem:[#allocation7 + $0x58] sm:$0xf0]  ;;  %v1098_v53 = vor.u32 %v1164_v48, %v1095_v49  ;;  %v1087_v56 = vld [vmem:[#allocation7 + $0xc8] sm:$0xf0] }
  0x49   : > { %v1034_v54 = vor.u32 %v1148_v50, %v1031_v51  ;;  %v1146_v57 = vld [vmem:[#allocation7 + $0x44] sm:$0xf]  ;;  %v1023_v58 = vld [vmem:[#allocation7 + $0x48] sm:$0xf0]  ;;  %v1090_v59 = vor.u32 %v1162_v55, %v1087_v56  ;;  %v1144_v61 = vld [vmem:[#allocation7 + $0x34] sm:$0xf] }
  0x4a   : > { %750 = vmatpush.bf16.msrb.mxu3 %v1102_v10  ;;  %514 = vmatpush.bf16.msra.mxu2 %v920_v15  ;;  %v1026_v60 = vor.u32 %v1146_v57, %v1023_v58  ;;  %v1015_v62 = vld [vmem:[#allocation7 + $0x38] sm:$0xf0]  ;;  %v1005_v0 = vld [vmem:[#allocation7 + $0x20] sm:$0xf]  ;;  %v1143_v1 = vld [vmem:[#allocation7 + $0x24] sm:$0xf0] }
  0x4b   : > { %737 = vmatpush.bf16.msrb.mxu1 %v1038_v12  ;;  %488 = vmatpush.bf16.msra.mxu0 %v916_v19  ;;  %v1018_v63 = vor.u32 %v1144_v61, %v1015_v62  ;;  %v1077_v2 = vld [vmem:[#allocation7 + $0xb0] sm:$0xf]  ;;  %v1006_v3 = vor.u32 %v1143_v1, %v1005_v0  ;;  %v1161_v4 = vld [vmem:[#allocation7 + $0xb4] sm:$0xf0]  ;;  %v1142_v5 = vld [vmem:[#allocation7 + $0x24] sm:$0xf] }
  0x4c   : > { %v1007_v6 = vld [vmem:[#allocation7 + $0x28] sm:$0xf0]  ;;  %v1078_v7 = vor.u32 %v1161_v4, %v1077_v2  ;;  %v1160_v9 = vld [vmem:[#allocation7 + $0xb4] sm:$0xf]  ;;  %v1079_v10 = vld [vmem:[#allocation7 + $0xb8] sm:$0xf0] }
  0x4d   : > { %v1010_v8 = vor.u32 %v1142_v5, %v1007_v6  ;;  %v1082_v11 = vor.u32 %v1160_v9, %v1079_v10  ;;  %v997_v12 = vld [vmem:[#allocation7 + $0x10] sm:$0xf]  ;;  %v1141_v13 = vld [vmem:[#allocation7 + $0x14] sm:$0xf0]  ;;  %v1069_v14 = vld [vmem:[#allocation7 + $0xa0] sm:$0xf] }
  0x4e   : > { %751 = vmatpush.bf16.msrb.mxu3 %v1094_v26  ;;  %515 = vmatpush.bf16.msra.mxu2 %v912_v30  ;;  %v998_v15 = vor.u32 %v1141_v13, %v997_v12  ;;  %v1159_v16 = vld [vmem:[#allocation7 + $0xa4] sm:$0xf0]  ;;  %v1140_v17 = vld [vmem:[#allocation7 + $0x14] sm:$0xf]  ;;  %v999_v18 = vld [vmem:[#allocation7 + $0x18] sm:$0xf0] }
  0x4f   : > { %738 = vmatpush.bf16.msrb.mxu1 %v1030_v27  ;;  %489 = vmatpush.bf16.msra.mxu0 %v908_v34  ;;  %v1070_v19 = vor.u32 %v1159_v16, %v1069_v14  ;;  %v1002_v20 = vor.u32 %v1140_v17, %v999_v18  ;;  %v1158_v21 = vld [vmem:[#allocation7 + $0xa4] sm:$0xf]  ;;  %v1071_v22 = vld [vmem:[#allocation7 + $0xa8] sm:$0xf0]  ;;  %v989_v24 = vld [vmem:[#allocation7] sm:$0xf] }
  0x50   : > { %v1074_v23 = vor.u32 %v1158_v21, %v1071_v22  ;;  %v1139_v25 = vld [vmem:[#allocation7 + $0x4] sm:$0xf0]  ;;  %v1061_v27 = vld [vmem:[#allocation7 + $0x90] sm:$0xf]  ;;  %v1157_v28 = vld [vmem:[#allocation7 + $0x94] sm:$0xf0] }
  0x51   : > { %516 = vmatmul.bf16.vlgmr.msra.gmra.mxu2 %v335_v40  ;;  %v990_v26 = vor.u32 %v1139_v25, %v989_v24  ;;  %v1138_v29 = vld [vmem:[#allocation7 + $0x4] sm:$0xf]  ;;  %v1062_v30 = vor.u32 %v1157_v28, %v1061_v27  ;;  %v991_v31 = vld [vmem:[#allocation7 + $0x8] sm:$0xf0]  ;;  %v1156_v32 = vld [vmem:[#allocation7 + $0x94] sm:$0xf] }
  0x52   : > { %775 = vmatpush.bf16.msrb.mxu2 %v1114_v35  ;;  %752 = vmatpush.bf16.msrb.mxu3 %v1086_v39  ;;  %v1063_v33 = vld [vmem:[#allocation7 + $0x98] sm:$0xf0]  ;;  %v994_v34 = vor.u32 %v1138_v29, %v991_v31  ;;  %v1155_v37 = vld [vmem:[#allocation7 + $0x84] sm:$0xf0]  ;;  %v1154_v38 = vld [vmem:[#allocation7 + $0x84] sm:$0xf] }
  0x53   : > { %762 = vmatpush.bf16.msrb.mxu0 %v1050_v36  ;;  %739 = vmatpush.bf16.msrb.mxu1 %v1022_v43  ;;  %v1066_v35 = vor.u32 %v1156_v32, %v1063_v33  ;;  %v1053_v36 = vld [vmem:[#allocation7 + $0x80] sm:$0xf]  ;;  %v358_v44 = vld [vmem:[%s1541_s2] sm:$0x3]  ;;  %s904_s26 = sshll.u32 %s1555_s9, 3  ;;  %vm806_vm2 = vcmask 7168  }
  0x54   : > { %490 = vmatmul.bf16.vlgmr.msra.gmra.mxu0 %v335_v40  ;;  %v1054_v39 = vor.u32 %v1155_v37, %v1053_v36  ;;  %v1055_v40 = vld [vmem:[#allocation7 + $0x88] sm:$0xf0]  ;;  %v360_v45 = vperm.slane %v358_v44, 0  ;;  %v361_v49 = vperm.slane %v358_v44, 1  ;;  %v790_v6 = vld [vmem:[%s1544_s5] sm:$0x3]  ;;  %s331_s29 = scalar_lea.vmem %s1546_s7, %s904_s26 }
  0x55   : > { %v1058_v41 = vor.u32 %v1154_v38, %v1055_v40  ;;  %v793_v12 = vperm.slane %v790_v6, 1 }
  0x56   : > { %776 = vmatpush.bf16.msrb.mxu2 %v1106_v46  ;;  %753 = vmatpush.bf16.msrb.mxu3 %v1078_v7 }
  0x57   : > { %763 = vmatpush.bf16.msrb.mxu0 %v1042_v47  ;;  %740 = vmatpush.bf16.msrb.mxu1 %v1014_v52 }
  0x5a   : > { %777 = vmatpush.bf16.msrb.mxu2 %v1098_v53  ;;  %754 = vmatpush.bf16.msrb.mxu3 %v1070_v19 }
  0x5b   : > { %764 = vmatpush.bf16.msrb.mxu0 %v1034_v54  ;;  %741 = vmatpush.bf16.msrb.mxu1 %v1006_v3 }
  0x5e   : > { %778 = vmatpush.bf16.msrb.mxu2 %v1090_v59  ;;  %755 = vmatpush.bf16.msrb.mxu3 %v1062_v30 }
  0x5f   : > { %765 = vmatpush.bf16.msrb.mxu0 %v1026_v60  ;;  %742 = vmatpush.bf16.msrb.mxu1 %v998_v15 }
  0x62   : > { %779 = vmatpush.bf16.msrb.mxu2 %v1082_v11  ;;  %756 = vmatpush.bf16.msrb.mxu3 %v1054_v39  ;;  %v792_v11 = vperm.slane %v790_v6, 0 }
  0x63   : > { %766 = vmatpush.bf16.msrb.mxu0 %v1018_v63  ;;  %743 = vmatpush.bf16.msrb.mxu1 %v990_v26  ;;  %v570_v63 = vld [vmem:[%s1543_s4] sm:$0x3] }
  0x64   : > { %v572_v0 = vperm.slane %v570_v63, 0  ;;  %v573_v1 = vperm.slane %v570_v63, 1 }
  0x66   : > { %780 = vmatpush.bf16.msrb.mxu2 %v1074_v23 }
  0x67   : > { %767 = vmatpush.bf16.msrb.mxu0 %v1010_v8 }
  0x6a   : > { %781 = vmatpush.bf16.msrb.mxu2 %v1066_v35 }
  0x6b   : > { %768 = vmatpush.bf16.msrb.mxu0 %v1002_v20  ;;  %v1233_v20 = vld [vmem:[#allocation2] ss:$0 sm:$0xff] }
  0x6e   : > { %782 = vmatpush.bf16.msrb.mxu2 %v1058_v41 }
  0x6f   : > { %769 = vmatpush.bf16.msrb.mxu0 %v994_v34 }
  0xc5   : > { %v504_v42 = vpop.f32.mrf.mxu1 }
  0xc8   : > { %v530_v43 = vpop.f32.mrf.mxu3 }
  0xcd   : > { %v506_v46 = vpop.f32.mrf.mxu1 }
  0xd0   : > { %v532_v50 = vpop.f32.mrf.mxu3 }
  0xd1   : > { %v491_v47 = vpop.f32.mrf.mxu0 }
  0xd2   : > { %v492_v48 = vadd.f32 %v491_v47, %v360_v45 }
  0xd4   : > { %v505_v51 = vadd.f32 %v504_v42, %v492_v48  ;;  %v517_v53 = vpop.f32.mrf.mxu2 }
  0xd5   : > { %v518_v54 = vadd.f32 %v517_v53, %v361_v49 }
  0xd6   : > { %v534_v52 = vmax.f32 %v505_v51, 0.0 }
  0xd7   : > { %v531_v56 = vadd.f32 %v530_v43, %v518_v54 }
  0xd8   : > { %v536_v55 = vpack.c.bf16 %v534_v52, %v534_v52 }
  0xd9   : > { %v493_v57 = vpop.f32.mrf.mxu0  ;;  %v535_v58 = vmax.f32 %v531_v56, 0.0 }
  0xda   : > { %744 = vmatmul.bf16.vlgmr.msrb.gmra.mxu1 %v536_v55  ;;  %770 = vmatmul.bf16.vlgmr.msrb.gmra.mxu0 %v536_v55 }
  0xdb   : > { %v537_v59 = vpack.c.bf16 %v535_v58, %v535_v58 }
  0xdc   : > { %v519_v60 = vpop.f32.mrf.mxu2 }
  0xdd   : > { %757 = vmatmul.bf16.vlgmr.msrb.gmra.mxu3 %v537_v59  ;;  %783 = vmatmul.bf16.vlgmr.msrb.gmra.mxu2 %v537_v59 }
 0x157   : > { %v745_v61 = vpop.f32.mrf.mxu1  ;;  %v771_v62 = vpop.f32.mrf.mxu0 }
 0x158   : > { %v746_v2 = vadd.f32 %v745_v61, %v572_v0  ;;  %v772_v3 = vadd.f32 %v771_v62, %v573_v1 }
 0x15f   : > { %v747_v4 = vpop.f32.mrf.mxu1  ;;  %v773_v5 = vpop.f32.mrf.mxu0 }
 0x160   : > { %v758_v7 = vpop.f32.mrf.mxu3  ;;  %v784_v8 = vpop.f32.mrf.mxu2 }
 0x161   : > { %v759_v9 = vadd.f32 %v758_v7, %v746_v2  ;;  %v785_v10 = vadd.f32 %v784_v8, %v772_v3 }
 0x163   : > { %v788_v13 = vmax.f32 %v759_v9, 0.0  ;;  %v789_v14 = vmax.f32 %v785_v10, 0.0 }
 0x165   : > { %v796_v15 = vmul.f32 %v792_v11, %v788_v13  ;;  %v797_v16 = vmul.f32 %v793_v12, %v789_v14 }
 0x167   : > { %v798_v17 = vadd.f32 %v797_v16, %v796_v15 }
 0x168   : > { %v760_v18 = vpop.f32.mrf.mxu3  ;;  %v786_v19 = vpop.f32.mrf.mxu2 }
 0x169   : > { %799 = vadd.xlane.f32.xlu0 %v798_v17 }
 0x1dc   : > { %v800_v21 = vpop.xlane.xlu0 %799 }
 0x1dd   : > { %v805_v22 = vadd.f32 %v1233_v20, %v800_v21 }
 0x1df   : > { %807 = vst.msk [vmem:[%s331_s29] sm:$0xff] %vm806_vm2, %v805_v22 }
 0x1e0 PF: > { %p20_p3 = scmp.ge.s32.totalorder %s1453_s20, 4   ;;  %s1550_s26 = smov %s1354_s27 }
 0x1e1   : > { %s1551_s27 = smov %s1358_s28  ;;  %s1552_s28 = smov %s1464_s23 }
 0x1e2   : > { %s1553_s29 = smov %s1453_s20  ;;  %22 = sbr.rel (!%p20_p3) target bundleno = 7 (0x7), region = 96 }
 0x1e7   :  { %827 = vsyncpa [#allocation4], 1 }
 0x1e8   :  { %829 = vsyncpa [#allocation4 + $0x1], 1 }
 0x1e9   :  { %830 = vsyncpa [#allocation6], 1 }

</bundles_post_ra>
